<compile_context>
chip_gen: v6e
topology: v6e:2x2x1
jax: 0.10.0
libtpu: 0.0.40
codegen_flags: <defaults>
</compile_context>

<pallas_src>
import functools

import jax
import jax.numpy as jnp
from jax.experimental import pallas as pl
from jax.experimental.pallas import tpu as pltpu

IN_F = 2
HIDDEN = 50
HIDDEN_PAD = 56   # 50 -> 56: multiple of 8 sublanes (was 64)
OUT_F = 2


def _round_up(a, m):
    return ((a + m - 1) // m) * m


def _mlp_kernel(xt_ref, w1t_ref, b1t_ref, w2p_ref, b2t_ref, ot_ref):
    xt = xt_ref[...]                       # (IN_F, TB)          f32
    w1t = w1t_ref[...]                     # (HIDDEN_PAD, IN_F)
    w2p = w2p_ref[...]                     # (HIDDEN_PAD, OUT_F)

    # ---- layer 1: h = W1^T x + b1.  K == 2 -> two VPU broadcast FMAs.
    h = (w1t[:, 0:1] * xt[0:1, :]
         + w1t[:, 1:2] * xt[1:2, :]
         + b1t_ref[...])                   # (HIDDEN_PAD, TB)
    h = jnp.tanh(h)                        # EUP slot

    # ---- layer 2: out_i = sum_j W2[j,i] * h_j + b2_i.  M == 2 -> skip MXU.
    # Write the two output rows directly (no jnp.concatenate -> no
    # cross-sublane relayout of (2, TB) data every grid step).
    o0 = jnp.sum(w2p[:, 0:1] * h, axis=0, keepdims=True) + b2t_ref[0:1, :]
    o1 = jnp.sum(w2p[:, 1:2] * h, axis=0, keepdims=True) + b2t_ref[1:2, :]
    ot_ref[0:1, :] = o0.astype(ot_ref.dtype)
    ot_ref[1:2, :] = o1.astype(ot_ref.dtype)


@functools.partial(jax.jit, static_argnames=("block_b",))
def mymodel_forward_pallas(x, w1, b1, w2, b2, *, block_b=8192):
    """Pallas forward.

    x: (B, 2) f32, w1: (2, 50), b1: (50,), w2: (50, 2), b2: (2,)
    returns (B, 2) f32
    """
    B = x.shape[0]

    # Batch tile: always a multiple of 128 lanes, capped at the batch extent.
    b_lanes = _round_up(max(B, 1), 128)
    tb = min(_round_up(block_b, 128), b_lanes)
    # v7x: if the batch spans >128 lanes but would fit one tile, split it so
    # the "parallel" grid axis has >= 2 steps and both TensorCores get work.
    if b_lanes > 128 and pl.cdiv(b_lanes, tb) < 2:
        tb = max(128, _round_up(pl.cdiv(b_lanes, 2), 128))
    n_tiles = pl.cdiv(B, tb)

    # Single layout pass over x (no zero-padded copy, no dynamic-update-slice):
    # Pallas masks the ragged tail tile itself.
    xt = x.T                                                        # (2, B)

    # Tiny parameter tensors, padded 50 -> 56 with zeros (padded rows give
    # tanh(0) * 0 = 0, so the result is exact).
    w1t = jnp.zeros((HIDDEN_PAD, IN_F), w1.dtype).at[:HIDDEN, :].set(w1.T)
    b1t = jnp.zeros((HIDDEN_PAD, 1), b1.dtype).at[:HIDDEN, 0].set(b1)
    w2p = jnp.zeros((HIDDEN_PAD, OUT_F), w2.dtype).at[:HIDDEN, :].set(w2)
    b2t = b2.reshape(OUT_F, 1)

    cost = pl.CostEstimate(
        flops=2 * B * HIDDEN * (IN_F + OUT_F),
        transcendentals=B * HIDDEN,
        bytes_accessed=4 * B * (IN_F + OUT_F)
        + 4 * (HIDDEN * (IN_F + OUT_F) + HIDDEN + OUT_F),
    )

    ot = pl.pallas_call(
        _mlp_kernel,
        out_shape=jax.ShapeDtypeStruct((OUT_F, B), x.dtype),
        grid_spec=pltpu.PrefetchScalarGridSpec(
            num_scalar_prefetch=0,
            grid=(n_tiles,),
            in_specs=[
                # x^T tiles stream over the batch (lane) axis; last tile may
                # be ragged and is masked by Pallas.
                pl.BlockSpec((IN_F, tb), lambda i: (0, i)),
                # Weights/biases: same block every step -> stay VMEM-resident.
                pl.BlockSpec((HIDDEN_PAD, IN_F), lambda i: (0, 0)),
                pl.BlockSpec((HIDDEN_PAD, 1), lambda i: (0, 0)),
                pl.BlockSpec((HIDDEN_PAD, OUT_F), lambda i: (0, 0)),
                pl.BlockSpec((OUT_F, 1), lambda i: (0, 0)),
            ],
            out_specs=pl.BlockSpec((OUT_F, tb), lambda i: (0, i)),
        ),
        compiler_params=pltpu.CompilerParams(
            # Independent batch tiles -> shard across v7x's 2 TensorCores.
            dimension_semantics=("parallel",),
        ),
        cost_estimate=cost,
    )(xt, w1t, b1t, w2p, b2t)

    return ot.T                                                     # (B, 2)


def mymodel_forward(x, w1, b1, w2, b2, *, block_b=8192, force_pallas=False):
    """Dispatcher: tiny/mid batches go to fused XLA; large batches use Pallas."""
    if x.shape[0] < 1024 and not force_pallas:
        return jnp.tanh(x @ w1 + b1) @ w2 + b2
    return mymodel_forward_pallas(x, w1, b1, w2, b2, block_b=block_b)


def init_params(key):
    """Deterministic init mimicking nn.Linear's U(-1/sqrt(fan_in), ...)."""
    k1, k2, k3, k4 = jax.random.split(key, 4)
    bound1 = 1.0 / jnp.sqrt(jnp.float32(IN_F))
    bound2 = 1.0 / jnp.sqrt(jnp.float32(HIDDEN))
    # Stored transposed relative to torch (out, in) -> (in, out).
    w1 = jax.random.uniform(k1, (IN_F, HIDDEN), jnp.float32, -bound1, bound1)
    b1 = jax.random.uniform(k2, (HIDDEN,), jnp.float32, -bound1, bound1)
    w2 = jax.random.uniform(k3, (HIDDEN, OUT_F), jnp.float32, -bound2, bound2)
    b2 = jax.random.uniform(k4, (OUT_F,), jnp.float32, -bound2, bound2)
    return w1, b1, w2, b2


def reference_forward(x, w1, b1, w2, b2):
    h = jnp.tanh(jnp.dot(x, w1, precision=jax.lax.Precision.HIGHEST) + b1)
    return jnp.dot(h, w2, precision=jax.lax.Precision.HIGHEST) + b2


if __name__ == "__main__":
    key = jax.random.PRNGKey(0)
    kx, kp = jax.random.split(key)
    w1, b1, w2, b2 = init_params(kp)

    # Multi-tile batch: with block_b=128 this gives grid=(2,).
    B = 256
    x = jax.random.normal(kx, (B, 2), jnp.float32)
    out = jax.block_until_ready(
        mymodel_forward_pallas(x, w1, b1, w2, b2, block_b=128))
    ref = reference_forward(x, w1, b1, w2, b2)
    assert out.shape == (B, 2)
    assert jnp.allclose(out, ref, atol=2e-5, rtol=2e-5)

    # Ragged batch (not a multiple of 128): exercises the masked tail tile.
    Br = 200
    xr = jax.random.normal(kx, (Br, 2), jnp.float32)
    out_r = jax.block_until_ready(
        mymodel_forward_pallas(xr, w1, b1, w2, b2, block_b=128))
    assert out_r.shape == (Br, 2)
    assert jnp.allclose(out_r, reference_forward(xr, w1, b1, w2, b2),
                        atol=2e-5, rtol=2e-5)
    assert jnp.all(jnp.isfinite(out_r))

    # Tiny batch through the Pallas path (single partial 128-lane tile).
    x_small = jax.random.normal(kx, (8, 2), jnp.float32)
    out_s = jax.block_until_ready(
        mymodel_forward_pallas(x_small, w1, b1, w2, b2, block_b=128))
    assert out_s.shape == (8, 2)
    assert jnp.allclose(out_s, reference_forward(x_small, w1, b1, w2, b2),
                        atol=2e-5, rtol=2e-5)

    # Default (large-tile) config exercised once as well.
    out_big = jax.block_until_ready(mymodel_forward_pallas(x, w1, b1, w2, b2))
    assert jnp.allclose(out_big, ref, atol=2e-5, rtol=2e-5)

    # Dispatcher fast path for tiny batches (pure XLA, no pallas_call).
    out_d = jax.block_until_ready(mymodel_forward(x_small, w1, b1, w2, b2))
    assert jnp.allclose(out_d, reference_forward(x_small, w1, b1, w2, b2),
                        atol=2e-5, rtol=2e-5)

    print("KERNEL_OK")
</pallas_src>

<mosaic_0001>
module attributes {stable_mosaic.version = 11 : i64} {
  func.func @_mlp_kernel(%arg0: i32, %arg1: memref<2x128xf32, #tpu.memory_space<vmem>>, %arg2: memref<56x2xf32, #tpu.memory_space<vmem>>, %arg3: memref<56x1xf32, #tpu.memory_space<vmem>>, %arg4: memref<56x2xf32, #tpu.memory_space<vmem>>, %arg5: memref<2x1xf32, #tpu.memory_space<vmem>>, %arg6: memref<2x128xf32, #tpu.memory_space<vmem>>) attributes {dimension_semantics = [#tpu.dimension_semantics<parallel>], iteration_bounds = array<i64: 2>, scalar_prefetch = 0 : i64, scratch_operands = 0 : i64, tpu.core_type = #tpu.core_type<tc>, window_params = [{transform_indices = @transform_0, window_bounds = array<i64: 2, 128>}, {pipeline_mode = #tpu.pipeline_mode<synchronous>, transform_indices = @transform_1, window_bounds = array<i64: 56, 2>}, {pipeline_mode = #tpu.pipeline_mode<synchronous>, transform_indices = @transform_2, window_bounds = array<i64: 56, 1>}, {pipeline_mode = #tpu.pipeline_mode<synchronous>, transform_indices = @transform_3, window_bounds = array<i64: 56, 2>}, {pipeline_mode = #tpu.pipeline_mode<synchronous>, transform_indices = @transform_4, window_bounds = array<i64: 2, 1>}, {transform_indices = @transform_5, window_bounds = array<i64: 2, 128>}]} {
    %c0 = arith.constant 0 : index
    %c0_0 = arith.constant 0 : index
    %0 = vector.load %arg1[%c0, %c0_0] : memref<2x128xf32, #tpu.memory_space<vmem>>, vector<2x128xf32>
    %c0_1 = arith.constant 0 : index
    %c0_2 = arith.constant 0 : index
    %1 = vector.load %arg2[%c0_1, %c0_2] : memref<56x2xf32, #tpu.memory_space<vmem>>, vector<56x2xf32>
    %c0_3 = arith.constant 0 : index
    %c0_4 = arith.constant 0 : index
    %2 = vector.load %arg4[%c0_3, %c0_4] : memref<56x2xf32, #tpu.memory_space<vmem>>, vector<56x2xf32>
    %3 = vector.extract_strided_slice %1 {offsets = [0, 0], sizes = [56, 1], strides = [1, 1]} : vector<56x2xf32> to vector<56x1xf32>
    %4 = vector.extract_strided_slice %0 {offsets = [0, 0], sizes = [1, 128], strides = [1, 1]} : vector<2x128xf32> to vector<1x128xf32>
    %5 = vector.broadcast %3 : vector<56x1xf32> to vector<56x128xf32>
    %6 = vector.broadcast %4 : vector<1x128xf32> to vector<56x128xf32>
    %7 = arith.mulf %5, %6 : vector<56x128xf32>
    %8 = vector.extract_strided_slice %1 {offsets = [0, 1], sizes = [56, 1], strides = [1, 1]} : vector<56x2xf32> to vector<56x1xf32>
    %9 = vector.extract_strided_slice %0 {offsets = [1, 0], sizes = [1, 128], strides = [1, 1]} : vector<2x128xf32> to vector<1x128xf32>
    %10 = vector.broadcast %8 : vector<56x1xf32> to vector<56x128xf32>
    %11 = vector.broadcast %9 : vector<1x128xf32> to vector<56x128xf32>
    %12 = arith.mulf %10, %11 : vector<56x128xf32>
    %13 = arith.addf %7, %12 : vector<56x128xf32>
    %c0_5 = arith.constant 0 : index
    %c0_6 = arith.constant 0 : index
    %14 = vector.load %arg3[%c0_5, %c0_6] : memref<56x1xf32, #tpu.memory_space<vmem>>, vector<56x1xf32>
    %15 = vector.broadcast %14 : vector<56x1xf32> to vector<56x128xf32>
    %16 = arith.addf %13, %15 : vector<56x128xf32>
    %17 = math.tanh %16 : vector<56x128xf32>
    %18 = vector.extract_strided_slice %2 {offsets = [0, 0], sizes = [56, 1], strides = [1, 1]} : vector<56x2xf32> to vector<56x1xf32>
    %19 = vector.broadcast %18 : vector<56x1xf32> to vector<56x128xf32>
    %20 = arith.mulf %19, %17 : vector<56x128xf32>
    %cst = arith.constant dense<0.000000e+00> : vector<128xf32>
    %21 = vector.multi_reduction <add>, %20, %cst [0] : vector<56x128xf32> to vector<128xf32>
    %22 = vector.shape_cast %21 : vector<128xf32> to vector<1x128xf32>
    %c0_7 = arith.constant 0 : index
    %c0_8 = arith.constant 0 : index
    %23 = vector.load %arg5[%c0_7, %c0_8] : memref<2x1xf32, #tpu.memory_space<vmem>>, vector<1x1xf32>
    %24 = vector.broadcast %23 : vector<1x1xf32> to vector<1x128xf32>
    %25 = arith.addf %22, %24 : vector<1x128xf32>
    %26 = vector.extract_strided_slice %2 {offsets = [0, 1], sizes = [56, 1], strides = [1, 1]} : vector<56x2xf32> to vector<56x1xf32>
    %27 = vector.broadcast %26 : vector<56x1xf32> to vector<56x128xf32>
    %28 = arith.mulf %27, %17 : vector<56x128xf32>
    %cst_9 = arith.constant dense<0.000000e+00> : vector<128xf32>
    %29 = vector.multi_reduction <add>, %28, %cst_9 [0] : vector<56x128xf32> to vector<128xf32>
    %30 = vector.shape_cast %29 : vector<128xf32> to vector<1x128xf32>
    %c1 = arith.constant 1 : index
    %c0_10 = arith.constant 0 : index
    %31 = vector.load %arg5[%c1, %c0_10] : memref<2x1xf32, #tpu.memory_space<vmem>>, vector<1x1xf32>
    %32 = vector.broadcast %31 : vector<1x1xf32> to vector<1x128xf32>
    %33 = arith.addf %30, %32 : vector<1x128xf32>
    %c0_11 = arith.constant 0 : index
    %c0_12 = arith.constant 0 : index
    %34 = vector.load %arg6[%c0_11, %c0_12] : memref<2x128xf32, #tpu.memory_space<vmem>>, vector<1x128xf32>
    tpu.vector_store %arg6[%c0_11, %c0_12], %25 {strides = array<i32>} : memref<2x128xf32, #tpu.memory_space<vmem>>, vector<1x128xf32>,
    %c1_13 = arith.constant 1 : index
    %c0_14 = arith.constant 0 : index
    %35 = vector.load %arg6[%c1_13, %c0_14] : memref<2x128xf32, #tpu.memory_space<vmem>>, vector<1x128xf32>
    tpu.vector_store %arg6[%c1_13, %c0_14], %33 {strides = array<i32>} : memref<2x128xf32, #tpu.memory_space<vmem>>, vector<1x128xf32>,
    return
  }
  func.func @transform_0(%arg0: i32) -> (i32, i32) {
    %c0_i32 = arith.constant 0 : i32
    %c0_i32_0 = arith.constant 0 : i32
    return %c0_i32, %arg0 : i32, i32
  }
  func.func @transform_1(%arg0: i32) -> (i32, i32) {
    %c0_i32 = arith.constant 0 : i32
    %c0_i32_0 = arith.constant 0 : i32
    %c0_i32_1 = arith.constant 0 : i32
    return %c0_i32, %c0_i32_0 : i32, i32
  }
  func.func @transform_2(%arg0: i32) -> (i32, i32) {
    %c0_i32 = arith.constant 0 : i32
    %c0_i32_0 = arith.constant 0 : i32
    %c0_i32_1 = arith.constant 0 : i32
    return %c0_i32, %c0_i32_0 : i32, i32
  }
  func.func @transform_3(%arg0: i32) -> (i32, i32) {
    %c0_i32 = arith.constant 0 : i32
    %c0_i32_0 = arith.constant 0 : i32
    %c0_i32_1 = arith.constant 0 : i32
    return %c0_i32, %c0_i32_0 : i32, i32
  }
  func.func @transform_4(%arg0: i32) -> (i32, i32) {
    %c0_i32 = arith.constant 0 : i32
    %c0_i32_0 = arith.constant 0 : i32
    %c0_i32_1 = arith.constant 0 : i32
    return %c0_i32, %c0_i32_0 : i32, i32
  }
  func.func @transform_5(%arg0: i32) -> (i32, i32) {
    %c0_i32 = arith.constant 0 : i32
    %c0_i32_0 = arith.constant 0 : i32
    return %c0_i32, %arg0 : i32, i32
  }
}

</mosaic_0001>

<bundles_post_ra>
// kernel: mymodel_forward_pallas.1
= control target key start
LH: loop header
LB: loop body
LE: loop exit
PB: predicated region body
PF: predicated region fallthrough
CT: control target
= control target key end

     0   :  { %10 = vsyncpa [#allocation3], 0  ;;  %s919_s0 = inlined_call_operand.vmem [shape: f32[2,256], index: 0, kind: input, shape index: {}]   ;;  %s920_s1 = inlined_call_operand.vmem [shape: f32[56,2], index: 1, kind: input, shape index: {}]   ;;  %s921_s2 = inlined_call_operand.vmem [shape: f32[56,1], index: 2, kind: input, shape index: {}]   ;;  %s922_s3 = inlined_call_operand.vmem [shape: f32[56,2], index: 3, kind: input, shape index: {}]   ;;  %s923_s4 = inlined_call_operand.vmem [shape: f32[2,1], index: 4, kind: input, shape index: {}]   ;;  %s924_s5 = inlined_call_operand.hbm [shape: f32[2,256], index: 5, kind: output, shape index: {}]  }
   0x1   :  { %12 = vsyncpa [#allocation3 + $0x1], 0  ;;  %s748_s18 = smov 0   ;;  %s750_s19 = smov 0  }
   0x2   :  { %s752_s20 = smov 0   ;;  %s754_s21 = smov 0  }
   0x3 LB: > { %s769_s22 = sadd.s32 4294967295, %s713_s21   ;;  %s573_s23 = sadd.s32 4294967294, %s713_s21   ;;  %s713_s21 = sphi %s754_s21, %s930_s21   ;;  %s709_s20 = sphi %s752_s20, %s929_s20   ;;  %s705_s19 = sphi %s750_s19, %s928_s19   ;;  %s701_s18 = sphi %s748_s18, %s927_s18  }
   0x4   : > { %s773_s24 = sadd.s32 1, %s713_s21   ;;  %s135_s25 = sadd.s32 1, %s709_s20 }
   0x5   : > { %s132_s26 = ssub.s32 %s713_s21, %s773_s24  ;;  %p145_p0 = scmp.ne.s32.totalorder %s709_s20, %s705_s19 }
   0x6   : > { %p133_p1 = scmp.eq.s32.totalorder %s132_s26, 0  ;;  %p146_p2 = scmp.eq.s32.totalorder %s769_s22, 1 }
   0x7   : > { %p151_p3 = scmp.ne.s32.totalorder %s705_s19, %s701_s18  ;;  %p152_p4 = scmp.eq.s32.totalorder %s573_s23, 1 }
   0x8   : > { %s784_s27 = scalar_select %p133_p1, %s709_s20, %s135_s25  }
   0x9   : > { %p786_p5 = por %p146_p2, %p145_p0  ;;  %p790_p6 = por %p152_p4, %p151_p3 }
   0xa   : > { %p576_p7 = scmp.ge.s32.totalorder %s713_s21, 1  ;;  %p189_p8 = scmp.lt.s32.totalorder %s713_s21, 3 }
   0xc   : > { %p190_p9 = pnand %p576_p7, %p189_p8 }
   0xd   : > { %p216_p10 = scmp.lt.s32.totalorder (!%p190_p9), %s769_s22, 1  ;;  %s213_s8 = sand.u32 (!%p190_p9), 1, %s705_s19  }
   0xe   : > { %193 = sbr.rel (%p190_p9) target bundleno = 261 (0x105), region = 40  ;;  %s577_s9 = sshll.u32 (!%p190_p9), %s213_s8, 1 }
   0xf   : > { %s215_s10 = scalar_lea.vmem (!%p190_p9), [#allocation2], %s577_s9  ;;  %s580_s11 = sshll.u32 (!%p190_p9), %s769_s22, 5 }
  0x10   : > { %s514_s12 = sshll.u32 (!%p190_p9), %s215_s10, 4  ;;  %s512_s15 = scalar_lea.hbm (!%p190_p9), %s924_s5, %s580_s11  ;;  %s515_s12 = int_to_ptr.vmem [resolvable:$true] %s514_s12 }
  0x11   : > { %s501_s16 = scalar_lea.sflag (!%p190_p9), [#allocation3], %s213_s8  ;;  %s653_s17 = scalar_lea.vmem (!%p190_p9), %s515_s12, 32 }
  0x12   : > { %p654_p11 = scmp.ne.s32.totalorder (!%p190_p9), %s515_s12, %s653_s17  ;;  %s717_s23 = smov (!%p190_p9), [#allocation2]  }
  0x13   : > { %v223_v0 = vld [vmem:[%s920_s1 + $0x10] sm:$0xff]  ;;  %v222_v1 = vld [vmem:[%s920_s1 + $0x8] sm:$0xff]  ;;  %v715_v2 = vmov 1   ;;  %v716_v3 = vmov 0   ;;  %v224_v4 = vld [vmem:[%s920_s1 + $0x18] sm:$0xff]  ;;  %s217_s25 = scalar_select %p216_p10, %s769_s22, 1  ;;  %v270_v37 = vlaneseq }
  0x14   : > { %626 = vset.pattern.permute.xlu0 %v715_v2  ;;  %624 = vset.pattern.permute.xlu1 %v716_v3  ;;  %v221_v5 = vld [vmem:[%s920_s1] sm:$0xff]  ;;  %v226_v6 = vld [vmem:[%s920_s1 + $0x28] sm:$0xff]  ;;  %v227_v8 = vld [vmem:[%s920_s1 + $0x30] sm:$0xff]  ;;  %p655_p12 = pnand %p654_p11, %p786_p5 }
  0x15   : > { %247 = vperm.xlu1 %624, %v223_v0   ;;  %286 = vperm.xlu0 %626, %v222_v1   ;;  %v225_v7 = vld [vmem:[%s920_s1 + $0x20] sm:$0xff]  ;;  %v329_v10 = vld [vmem:[%s921_s2 + $0x10] sm:$0xff]  ;;  %v328_v11 = vld [vmem:[%s921_s2 + $0x8] sm:$0xff]  ;;  %s578_s26 = sshll.u32 %s217_s25, 1  ;;  %v271_v40 = vshrl.u32 %v270_v37, 7  ;;  %s657_s25 = sshll.u32 %s717_s23, 4  ;;  %s658_s25 = int_to_ptr.vmem [resolvable:$false] %s657_s25 }
  0x16   : > { %v327_v9 = vld [vmem:[%s921_s2] sm:$0xff]  ;;  %v330_v12 = vld [vmem:[%s921_s2 + $0x18] sm:$0xff]  ;;  %v333_v14 = vld [vmem:[%s921_s2 + $0x30] sm:$0xff]  ;;  %s219_s7 = scalar_lea.vmem %s919_s0, %s578_s26  ;;  %p656_p13 = pneg %p655_p12 }
  0x17   : > { %v331_v13 = vld [vmem:[%s921_s2 + $0x20] sm:$0xff]  ;;  %v229_v15 = vld [vmem:[%s922_s3 + $0x8] sm:$0xff]  ;;  %v231_v17 = vld [vmem:[%s922_s3 + $0x18] sm:$0xff]  ;;  %v311_v42 = vsub.s32 1, %v271_v40  ;;  %v272_v43 = vsub.s32 0, %v271_v40  ;;  %s659_s22 = scalar_lea.vmem %s658_s25, 64  ;;  %p660_p0 = scmp.lt.s32.totalorder %s515_s12, %s658_s25 }
  0x18   : > { %v332_v16 = vld [vmem:[%s921_s2 + $0x28] sm:$0xff]  ;;  %v228_v18 = vld [vmem:[%s922_s3] sm:$0xff]  ;;  %v230_v20 = vld [vmem:[%s922_s3 + $0x10] sm:$0xff]  ;;  %p661_p1 = scmp.lt.s32.totalorder %s659_s22, %s653_s17 }
  0x19   : > { %252 = vperm.xlu1 %624, %v224_v4   ;;  %627 = vset.pattern.permute.xlu0 %v716_v3  ;;  %v232_v19 = vld [vmem:[%s922_s3 + $0x20] sm:$0xff]  ;;  %v234_v21 = vld [vmem:[%s922_s3 + $0x30] sm:$0xff]  ;;  %v233_v23 = vld [vmem:[%s922_s3 + $0x28] sm:$0xff] }
  0x1a   : > { %237 = vperm.xlu0 %627, %v221_v5   ;;  %v491_v22 = vld [vmem:[%s923_s4 + $0x1] sm:$0x1]  ;;  %v437_v24 = vld [vmem:[%s923_s4] sm:$0x1]  ;;  %p662_p2 = por %p661_p1, %p660_p0 }
  0x1b   : > { %v220_v44 = vld [vmem:[%s219_s7] sm:$0x3] }
  0x1c   : > { %v312_v47 = vrot.slane %v220_v44, %v311_v42  ;;  %v273_v48 = vrot.slane %v220_v44, %v272_v43  ;;  %p663_p3 = pnand %p662_p2, %p656_p13 }
  0x1d   : > { %262 = vperm.xlu1 %624, %v226_v6  }
  0x1e   : > { %242 = vperm.xlu0 %627, %v222_v1  }
  0x21   : > { %625 = vset.pattern.permute.xlu1 %v715_v2 }
  0x22   : > { %257 = vperm.xlu0 %627, %v225_v7   ;;  %282 = vperm.xlu1 %625, %v221_v5  }
  0x26   : > { %267 = vperm.xlu0 %627, %v227_v8   ;;  %290 = vperm.xlu1 %625, %v223_v0  }
  0x2a   : > { %336 = vperm.xlu0 %627, %v327_v9   ;;  %294 = vperm.xlu1 %625, %v224_v4  }
  0x2e   : > { %346 = vperm.xlu0 %627, %v329_v10   ;;  %628 = vset.pattern.permute.xlu1 %v716_v3 }
  0x2f   : > { %341 = vperm.xlu1 %628, %v328_v11  }
  0x32   : > { %351 = vperm.xlu0 %627, %v330_v12  }
  0x33   : > { %629 = vset.pattern.permute.xlu1 %v715_v2 }
  0x34   : > { %298 = vperm.xlu1 %629, %v225_v7  }
  0x36   : > { %356 = vperm.xlu0 %627, %v331_v13  }
  0x38   : > { %302 = vperm.xlu1 %629, %v226_v6  }
  0x3a   : > { %366 = vperm.xlu0 %627, %v333_v14  }
  0x3c   : > { %306 = vperm.xlu1 %629, %v227_v8  }
  0x3e   : > { %390 = vperm.xlu0 %627, %v229_v15  }
  0x40   : > { %630 = vset.pattern.permute.xlu1 %v716_v3 }
  0x41   : > { %361 = vperm.xlu1 %630, %v332_v16  }
  0x42   : > { %400 = vperm.xlu0 %627, %v231_v17  }
  0x45   : > { %385 = vperm.xlu1 %630, %v228_v18  }
  0x46   : > { %634 = vset.pattern.permute.xlu0 %v715_v2 }
  0x47   : > { %449 = vperm.xlu0 %634, %v229_v15  }
  0x49   : > { %631 = vset.pattern.permute.xlu1 %v715_v2 }
  0x4a   : > { %445 = vperm.xlu1 %631, %v228_v18  }
  0x4b   : > { %461 = vperm.xlu0 %634, %v232_v19  }
  0x4e   : > { %632 = vset.pattern.permute.xlu1 %v716_v3 }
  0x4f   : > { %637 = vset.pattern.permute.xlu0 %v716_v3  ;;  %395 = vperm.xlu1 %632, %v230_v20  }
  0x50   : > { %415 = vperm.xlu0 %637, %v234_v21  }
  0x53   : > { %633 = vset.pattern.permute.xlu1 %v715_v2 }
  0x54   : > { %453 = vperm.xlu1 %633, %v230_v20   ;;  %494 = vperm.xlu0 %637, %v491_v22  }
  0x58   : > { %457 = vperm.xlu1 %633, %v231_v17  }
  0x5c   : > { %635 = vset.pattern.permute.xlu1 %v716_v3 }
  0x5d   : > { %405 = vperm.xlu1 %635, %v232_v19  }
  0x61   : > { %410 = vperm.xlu1 %635, %v233_v23  }
  0x65   : > { %636 = vset.pattern.permute.xlu1 %v715_v2 }
  0x66   : > { %465 = vperm.xlu1 %636, %v233_v23  }
  0x6a   : > { %469 = vperm.xlu1 %636, %v234_v21  }
  0x6e   : > { %638 = vset.pattern.permute.xlu1 %v716_v3 }
  0x6f   : > { %440 = vperm.xlu1 %638, %v437_v24  }
  0x90   : > { %v248_v25 = vpop.permute.xlu1 %247  ;;  %v287_v26 = vpop.permute.xlu0 %286 }
  0x91   : > { %v314_v49 = vmul.f32 %v312_v47, %v287_v26  ;;  %v276_v59 = vmul.f32 %v273_v48, %v248_v25 }
  0x94   : > { %v253_v27 = vpop.permute.xlu1 %252 }
  0x95   : > { %v238_v28 = vpop.permute.xlu0 %237  ;;  %v277_v4 = vmul.f32 %v273_v48, %v253_v27 }
  0x96   : > { %v274_v52 = vmul.f32 %v273_v48, %v238_v28 }
  0x98   : > { %v263_v29 = vpop.permute.xlu1 %262 }
  0x99   : > { %v243_v30 = vpop.permute.xlu0 %242  ;;  %v279_v15 = vmul.f32 %v273_v48, %v263_v29 }
  0x9a   : > { %v275_v50 = vmul.f32 %v273_v48, %v243_v30 }
  0x9c   : > { %v321_v56 = vadd.f32 %v314_v49, %v275_v50 }
  0x9d   : > { %v258_v31 = vpop.permute.xlu0 %257  ;;  %v283_v32 = vpop.permute.xlu1 %282 }
  0x9e   : > { %v313_v53 = vmul.f32 %v312_v47, %v283_v32  ;;  %v278_v60 = vmul.f32 %v273_v48, %v258_v31 }
  0xa0   : > { %v320_v57 = vadd.f32 %v313_v53, %v274_v52 }
  0xa1   : > { %v268_v33 = vpop.permute.xlu0 %267  ;;  %v291_v34 = vpop.permute.xlu1 %290 }
  0xa2   : > { %v315_v55 = vmul.f32 %v312_v47, %v291_v34  ;;  %v280_v9 = vmul.f32 %v273_v48, %v268_v33 }
  0xa4   : > { %v322_v0 = vadd.f32 %v315_v55, %v276_v59 }
  0xa5   : > { %v295_v35 = vpop.permute.xlu1 %294  ;;  %v337_v36 = vpop.permute.xlu0 %336 }
  0xa6   : > { %v369_v61 = vadd.f32 %v337_v36, %v320_v57  ;;  %v316_v63 = vmul.f32 %v312_v47, %v295_v35 }
  0xa8   : > { %639 = vtanh.f32 %v369_v61  ;;  %v323_v7 = vadd.f32 %v316_v63, %v277_v4 }
  0xa9   : > { %v347_v39 = vpop.permute.xlu0 %346 }
  0xaa   : > { %v342_v38 = vpop.permute.xlu1 %341  ;;  %v371_v5 = vadd.f32 %v347_v39, %v322_v0 }
  0xab   : > { %v370_v1 = vadd.f32 %v342_v38, %v321_v56 }
  0xad   : > { %v352_v45 = vpop.permute.xlu0 %351  ;;  %641 = vtanh.f32 %v370_v1 }
  0xae   : > { %643 = vtanh.f32 %v371_v5  ;;  %v372_v11 = vadd.f32 %v352_v45, %v323_v7 }
  0xaf   : > { %v299_v41 = vpop.permute.xlu1 %298 }
  0xb0   : > { %v317_v2 = vmul.f32 %v312_v47, %v299_v41  ;;  %645 = vtanh.f32 %v372_v11 }
  0xb1   : > { %v357_v54 = vpop.permute.xlu0 %356 }
  0xb2   : > { %v324_v8 = vadd.f32 %v317_v2, %v278_v60 }
  0xb3   : > { %v303_v46 = vpop.permute.xlu1 %302 }
  0xb4   : > { %v318_v12 = vmul.f32 %v312_v47, %v303_v46  ;;  %v373_v16 = vadd.f32 %v357_v54, %v324_v8 }
  0xb5   : > { %v367_v62 = vpop.permute.xlu0 %366  ;;  %v640_v22 = vpop.eup %639 }
  0xb6   : > { %v325_v17 = vadd.f32 %v318_v12, %v279_v15  ;;  %647 = vtanh.f32 %v373_v16 }
  0xb7   : > { %v307_v51 = vpop.permute.xlu1 %306 }
  0xb8   : > { %v319_v6 = vmul.f32 %v312_v47, %v307_v51 }
  0xb9   : > { %v391_v10 = vpop.permute.xlu0 %390 }
  0xba   : > { %v326_v14 = vadd.f32 %v319_v6, %v280_v9  ;;  %v642_v24 = vpop.eup %641 }
  0xbb   : > { %v644_v27 = vpop.eup %643  ;;  %v419_v28 = vmul.f32 %v642_v24, %v391_v10 }
  0xbc   : > { %v362_v58 = vpop.permute.xlu1 %361  ;;  %v375_v18 = vadd.f32 %v367_v62, %v326_v14 }
  0xbd   : > { %v401_v19 = vpop.permute.xlu0 %400  ;;  %v374_v21 = vadd.f32 %v362_v58, %v325_v17  ;;  %v646_v32 = vpop.eup %645 }
  0xbe   : > { %649 = vtanh.f32 %v375_v18  ;;  %v421_v38 = vmul.f32 %v646_v32, %v401_v19 }
  0xbf   : > { %651 = vtanh.f32 %v374_v21 }
  0xc0   : > { %v386_v3 = vpop.permute.xlu1 %385 }
  0xc1   : > { %v418_v26 = vmul.f32 %v640_v22, %v386_v3 }
  0xc2   : > { %v450_v25 = vpop.permute.xlu0 %449 }
  0xc3   : > { %v425_v29 = vadd.f32 %v419_v28, %v418_v26  ;;  %v648_v35 = vpop.eup %647  ;;  %v473_v40 = vmul.f32 %v642_v24, %v450_v25 }
  0xc5   : > { %v446_v13 = vpop.permute.xlu1 %445 }
  0xc6   : > { %v462_v33 = vpop.permute.xlu0 %461  ;;  %v472_v36 = vmul.f32 %v640_v22, %v446_v13 }
  0xc7   : > { %v476_v57 = vmul.f32 %v648_v35, %v462_v33 }
  0xc8   : > { %v479_v45 = vadd.f32 %v473_v40, %v472_v36 }
  0xca   : > { %v396_v20 = vpop.permute.xlu1 %395 }
  0xcb   : > { %v420_v30 = vmul.f32 %v644_v27, %v396_v20  ;;  %v650_v42 = vpop.eup %649  ;;  %v416_v46 = vpop.permute.xlu0 %415 }
  0xcc   : > { %v652_v44 = vpop.eup %651  ;;  %v424_v52 = vmul.f32 %v650_v42, %v416_v46 }
  0xcd   : > { %v426_v34 = vadd.f32 %v425_v29, %v420_v30 }
  0xcf   : > { %v454_v23 = vpop.permute.xlu1 %453  ;;  %v427_v43 = vadd.f32 %v426_v34, %v421_v38  ;;  %v495_v14 = vpop.permute.xlu0 %494 }
  0xd0   : > { %v474_v41 = vmul.f32 %v644_v27, %v454_v23 }
  0xd2   : > { %v480_v51 = vadd.f32 %v479_v45, %v474_v41 }
  0xd3   : > { %v458_v31 = vpop.permute.xlu1 %457 }
  0xd4   : > { %v475_v47 = vmul.f32 %v646_v32, %v458_v31 }
  0xd6   : > { %v481_v54 = vadd.f32 %v480_v51, %v475_v47 }
  0xd8   : > { %v406_v37 = vpop.permute.xlu1 %405  ;;  %v482_v60 = vadd.f32 %v481_v54, %v476_v57 }
  0xd9   : > { %v422_v39 = vmul.f32 %v648_v35, %v406_v37 }
  0xdb   : > { %v428_v49 = vadd.f32 %v427_v43, %v422_v39 }
  0xdc   : > { %v411_v48 = vpop.permute.xlu1 %410 }
  0xdd   : > { %v423_v50 = vmul.f32 %v652_v44, %v411_v48 }
  0xdf   : > { %v429_v53 = vadd.f32 %v428_v49, %v423_v50 }
  0xe1   : > { %v430_v55 = vadd.f32 %v429_v53, %v424_v52  ;;  %v466_v56 = vpop.permute.xlu1 %465 }
  0xe2   : > { %v477_v58 = vmul.f32 %v652_v44, %v466_v56 }
  0xe3   : > { %v431_v59 = vrot.slane %v430_v55, 4 }
  0xe4   : > { %v483_v63 = vadd.f32 %v482_v60, %v477_v58 }
  0xe5   : > { %v470_v61 = vpop.permute.xlu1 %469  ;;  %v432_v62 = vadd.f32 %v431_v59, %v430_v55 }
  0xe6   : > { %v478_v0 = vmul.f32 %v650_v42, %v470_v61 }
  0xe7   : > { %v433_v1 = vrot.slane %v432_v62, 2 }
  0xe8   : > { %v484_v2 = vadd.f32 %v483_v63, %v478_v0 }
  0xe9   : > { %v434_v3 = vadd.f32 %v433_v1, %v432_v62 }
  0xea   : > { %v485_v4 = vrot.slane %v484_v2, 4  ;;  %v441_v7 = vpop.permute.xlu1 %440 }
  0xeb   : > { %v435_v5 = vrot.slane %v434_v3, 1 }
  0xec   : > { %v486_v6 = vadd.f32 %v485_v4, %v484_v2 }
  0xed   : > { %v436_v8 = vadd.f32 %v435_v5, %v434_v3 }
  0xee   : > { %v487_v9 = vrot.slane %v486_v6, 2 }
  0xef   : > { %v443_v10 = vadd.f32 %v441_v7, %v436_v8 }
  0xf0   : > { %v488_v11 = vadd.f32 %v487_v9, %v486_v6 }
  0xf1   : > { %498 = vst [vmem:[%s215_s10] sm:$0x1] %v443_v10 }
  0xf2   : > { %v489_v12 = vrot.slane %v488_v11, 1 }
  0xf4   : > { %v490_v13 = vadd.f32 %v489_v12, %v488_v11 }
  0xf6   : > { %v497_v15 = vadd.f32 %v495_v14, %v490_v13 }
  0xf8   : > { %499 = vst [vmem:[%s215_s10 + $0x1] sm:$0x1] %v497_v15 }
  0xf9   : > { %666 = shalt.err (!%p663_p3)
}
  0xfa   : > { %s667_s26 = scalar_lea.hbm %s512_s15, 32  ;;  %s671_s7 = scalar_lea.hbm %s924_s5, 64 }
  0xfb   : > { %p668_p4 = scmp.ne.s32.totalorder %s512_s15, %s667_s26  ;;  %p672_p9 = scmp.lt.s32.totalorder %s512_s15, %s924_s5 }
  0xfc   : > { %p673_p10 = scmp.lt.s32.totalorder %s671_s7, %s667_s26 }
  0xfd   : > { %p669_p7 = pnand %p668_p4, %p786_p5 }
  0xfe   : > { %p674_p11 = por %p673_p10, %p672_p9 }
  0xff   : > { %p670_p8 = pneg %p669_p7 }
 0x101   : > { %p675_p12 = pnand %p674_p11, %p670_p8 }
 0x103   : > { %678 = shalt.err (!%p675_p12)
}
 0x104   : > { %583 = dma.vmem_to_hbm [thread:$0]  (%p786_p5), %s515_s12, 32, %s512_s15, %s501_s16  }
 0x105 PF: > { %p589_p13 = scmp.ge.s32.totalorder %s713_s21, 2  ;;  %s526_s10 = sand.u32 1, %s701_s18  }
 0x106   : > { %s527_s11 = scalar_lea.sflag [#allocation3], %s526_s10 }
 0x107   : > { %p586_p0 = pnand %p589_p13, %p790_p6 }
 0x109   : > { %p587_p1 = pneg %p586_p0 }
 0x10b   : > { %696 = dma.done.wait (%p587_p1), %s527_s11, 32  }
 0x10c   : > { %698 = vsyncadd (%p587_p1), %s527_s11, 4294967264  ;;  %p15_p2 = scmp.ge.s32.totalorder %s773_s24, 4   ;;  %s927_s18 = smov %s705_s19 }
 0x10d   : > { %s928_s19 = smov %s709_s20  ;;  %s929_s20 = smov %s784_s27 }
 0x10e   : > { %s930_s21 = smov %s773_s24  ;;  %17 = sbr.rel (!%p15_p2) target bundleno = 3 (0x3), region = 75 }
 0x113   :  { %532 = vsyncpa [#allocation3], 1 }
 0x114   :  { %534 = vsyncpa [#allocation3 + $0x1], 1 }

</bundles_post_ra>
